<compile_context>
chip_gen: v6e
topology: v6e:2x2x1
jax: 0.10.0
libtpu: 0.0.40
codegen_flags: <defaults>
</compile_context>

<pallas_src>
import functools

import jax
import jax.numpy as jnp
from jax.experimental import pallas as pl
from jax.experimental.pallas import tpu as pltpu

HIDDEN_LAYER = 128
BN_EPS = 1e-5
LANE = 128


def _round_up(n, m):
    return ((n + m - 1) // m) * m


def _cdiv(a, b):
    return (a + b - 1) // b


def _choose_tiling(batch, max_tile):
    """Pick (TB, B_pad, grid_len): big tiles; even grid length when >1 (v7x 2 TCs)."""
    max_tile = max(256, _round_up(max_tile, 256))
    if batch <= max_tile:
        tb = _round_up(max(batch, 8), 16)          # single tile == full padded batch
        return tb, tb, 1
    n = _cdiv(batch, max_tile)
    if n % 2:
        n += 1                                     # even tile count -> even TC split on v7x
    tb = min(max_tile, _round_up(_cdiv(batch, n), 256))   # MXU M-dim aligned
    g = _cdiv(batch, tb)
    if g % 2:
        g += 1
    return tb, tb * g, g


def actor_kernel(x_ref, w1_ref, b1_ref, w2_ref, b2_ref, w3_ref, b3_ref,
                 out_ref, *, n_actions):
    # fc1 (BN already folded into w1/b1) + ReLU.
    # bf16 MXU inputs, f32 accumulate; elementwise math kept f32 (v5e-safe).
    h1 = jnp.dot(x_ref[...], w1_ref[...],
                 preferred_element_type=jnp.float32) + b1_ref[...]
    h1 = jnp.maximum(h1, 0.0).astype(jnp.bfloat16)          # (TB, H)

    # fc2 + ReLU
    h2 = jnp.dot(h1, w2_ref[...],
                 preferred_element_type=jnp.float32) + b2_ref[...]
    h2 = jnp.maximum(h2, 0.0).astype(jnp.bfloat16)          # (TB, H)

    # fc3: full 128-lane MXU tile (w3 padded), but store only the real columns.
    out = jnp.dot(h2, w3_ref[...],
                  preferred_element_type=jnp.float32) + b3_ref[...]   # (TB, A_pad)
    out_ref[...] = out[:, :n_actions].astype(out_ref.dtype)           # (TB, A)


@functools.partial(jax.jit, static_argnames=("max_tile",))
def actor_forward(x, params, *, max_tile=2048):
    """x: (B, inputs) float32. params: dict from init_actor_params."""
    x = x.astype(jnp.float32)
    B, n_in = x.shape
    H = params["w1"].shape[1]
    A = params["w3"].shape[1]

    # ---- BN pre-pass over the FULL batch (training-mode stats), folded into fc1 ----
    mean = jnp.mean(x, axis=0, keepdims=True)                 # (1, In)
    var = jnp.mean((x - mean) ** 2, axis=0, keepdims=True)    # biased variance
    invstd = jax.lax.rsqrt(var + BN_EPS)
    scale = params["gamma"] * invstd                          # (1, In)
    shift = params["beta"] - mean * scale                     # (1, In)
    w1 = (params["w1"] * scale.T).astype(jnp.bfloat16)        # (In, H), BN folded
    b1 = params["b1"] + shift @ params["w1"]                  # (1, H) f32

    # ---- batch tiling (stats were computed before padding) ----
    TB, B_pad, grid_len = _choose_tiling(B, max_tile)
    if B_pad != B:
        x = jnp.pad(x, ((0, B_pad - B), (0, 0)))
    xb = x.astype(jnp.bfloat16)                               # halve x DMA bytes

    # ---- fc3 weights padded to a full 128-lane tile; the OUTPUT stays A wide ----
    A_pad = _round_up(A, LANE)
    w3 = params["w3"]
    b3 = params["b3"]
    if A_pad != A:
        w3 = jnp.pad(w3, ((0, 0), (0, A_pad - A)))
        b3 = jnp.pad(b3, ((0, 0), (0, A_pad - A)))
    w2 = params["w2"].astype(jnp.bfloat16)
    w3 = w3.astype(jnp.bfloat16)

    tiled = lambda shape: pl.BlockSpec(shape, lambda i: (i, 0))       # batch-tiled
    resident = lambda shape: pl.BlockSpec(shape, lambda i: (0, 0))    # stays in VMEM

    out = pl.pallas_call(
        functools.partial(actor_kernel, n_actions=A),
        out_shape=jax.ShapeDtypeStruct((B_pad, A), jnp.float32),
        grid=(grid_len,),
        in_specs=[
            tiled((TB, n_in)),       # x (bf16)
            resident((n_in, H)),     # w1 (BN-folded, bf16)
            resident((1, H)),        # b1 (f32)
            resident((H, H)),        # w2 (bf16)
            resident((1, H)),        # b2 (f32)
            resident((H, A_pad)),    # w3 (bf16, lane-padded)
            resident((1, A_pad)),    # b3 (f32, lane-padded)
        ],
        out_specs=tiled((TB, A)),    # block last dim == full array dim -> legal
        compiler_params=pltpu.CompilerParams(
            dimension_semantics=("parallel",),
            vmem_limit_bytes=32 * 1024 * 1024),
    )(xb, w1, b1, w2, params["b2"], w3, b3)

    return out[:B]


def init_actor_params(key, n_inputs, n_actions):
    """Deterministic init mirroring the PyTorch module's shapes/ranges."""
    k1, k2, k3, k4, k5, k6 = jax.random.split(key, 6)

    def linear_init(kw, kb, fan_in, fan_out):
        # PyTorch Linear default: U(-1/sqrt(fan_in), 1/sqrt(fan_in))
        bound = 1.0 / jnp.sqrt(jnp.float32(fan_in))
        w = jax.random.uniform(kw, (fan_in, fan_out), jnp.float32, -bound, bound)
        b = jax.random.uniform(kb, (1, fan_out), jnp.float32, -bound, bound)
        return w, b

    w1, b1 = linear_init(k1, k2, n_inputs, HIDDEN_LAYER)
    w2, b2 = linear_init(k3, k4, HIDDEN_LAYER, HIDDEN_LAYER)
    # fc3 weight overridden to U(-0.003, 0.003) in __init__ (bias keeps default)
    w3 = jax.random.uniform(k5, (HIDDEN_LAYER, n_actions), jnp.float32, -0.003, 0.003)
    bound3 = 1.0 / jnp.sqrt(jnp.float32(HIDDEN_LAYER))
    b3 = jax.random.uniform(k6, (1, n_actions), jnp.float32, -bound3, bound3)

    return {
        "gamma": jnp.ones((1, n_inputs), jnp.float32),   # in_fn.weight.fill_(1)
        "beta": jnp.zeros((1, n_inputs), jnp.float32),   # in_fn.bias.fill_(0)
        "w1": w1, "b1": b1,
        "w2": w2, "b2": b2,
        "w3": w3, "b3": b3,
    }


def actor_reference_f32(x, p):
    """Pure-f32 JAX reference of the PyTorch forward (training-mode BN)."""
    x = x.astype(jnp.float32)
    mean = jnp.mean(x, axis=0, keepdims=True)
    var = jnp.mean((x - mean) ** 2, axis=0, keepdims=True)
    invstd = jax.lax.rsqrt(var + BN_EPS)
    xn = x * (p["gamma"] * invstd) + (p["beta"] - mean * p["gamma"] * invstd)
    h1 = jnp.maximum(xn @ p["w1"] + p["b1"], 0.0)
    h2 = jnp.maximum(h1 @ p["w2"] + p["b2"], 0.0)
    return h2 @ p["w3"] + p["b3"]


def actor_reference_matched(x, p):
    """Reference mirroring the kernel's folded-BN / bf16-matmul math exactly."""
    x = x.astype(jnp.float32)
    mean = jnp.mean(x, axis=0, keepdims=True)
    var = jnp.mean((x - mean) ** 2, axis=0, keepdims=True)
    invstd = jax.lax.rsqrt(var + BN_EPS)
    scale = p["gamma"] * invstd
    shift = p["beta"] - mean * scale
    w1 = (p["w1"] * scale.T).astype(jnp.bfloat16)
    b1 = p["b1"] + shift @ p["w1"]
    xb = x.astype(jnp.bfloat16)
    h1 = jnp.maximum(jnp.dot(xb, w1, preferred_element_type=jnp.float32) + b1,
                     0.0).astype(jnp.bfloat16)
    h2 = jnp.maximum(jnp.dot(h1, p["w2"].astype(jnp.bfloat16),
                             preferred_element_type=jnp.float32) + p["b2"],
                     0.0).astype(jnp.bfloat16)
    return jnp.dot(h2, p["w3"].astype(jnp.bfloat16),
                   preferred_element_type=jnp.float32) + p["b3"]


if __name__ == "__main__":
    key = jax.random.PRNGKey(0)
    k_x, k_x2, k_x3, k_p = jax.random.split(key, 4)

    N_INPUTS, N_ACTIONS = 32, 8
    params = init_actor_params(k_p, N_INPUTS, N_ACTIONS)

    # --- small batch (single grid step) ---
    B = 8
    x = jax.random.normal(k_x, (B, N_INPUTS), jnp.float32)
    out = jax.block_until_ready(actor_forward(x, params))
    assert out.shape == (B, N_ACTIONS)
    ref_m = actor_reference_matched(x, params)
    assert jnp.allclose(out, ref_m, atol=2e-3, rtol=2e-3), \
        f"max err vs matched ref {jnp.max(jnp.abs(out - ref_m))}"
    ref_f = actor_reference_f32(x, params)
    assert jnp.allclose(out, ref_f, atol=5e-2, rtol=5e-2), \
        f"max err vs f32 ref {jnp.max(jnp.abs(out - ref_f))}"

    # --- medium batch, single big tile (default max_tile) ---
    B2 = 300
    x2 = jax.random.normal(k_x2, (B2, N_INPUTS), jnp.float32)
    out2 = jax.block_until_ready(actor_forward(x2, params))
    assert out2.shape == (B2, N_ACTIONS)
    ref2 = actor_reference_matched(x2, params)
    assert jnp.allclose(out2, ref2, atol=2e-3, rtol=2e-3), \
        f"max err vs matched ref (B=300) {jnp.max(jnp.abs(out2 - ref2))}"

    # --- larger batch with a small max_tile to exercise the even multi-step grid ---
    B3 = 600
    x3 = jax.random.normal(k_x3, (B3, N_INPUTS), jnp.float32)
    out3 = jax.block_until_ready(actor_forward(x3, params, max_tile=256))
    assert out3.shape == (B3, N_ACTIONS)
    ref3 = actor_reference_matched(x3, params)
    assert jnp.allclose(out3, ref3, atol=2e-3, rtol=2e-3), \
        f"max err vs matched ref (B=600) {jnp.max(jnp.abs(out3 - ref3))}"

    print("KERNEL_OK")
</pallas_src>

<mosaic_0001>
module attributes {stable_mosaic.version = 11 : i64} {
  func.func @actor_kernel(%arg0: i32, %arg1: memref<16x32xbf16, #tpu.memory_space<vmem>>, %arg2: memref<32x128xbf16, #tpu.memory_space<vmem>>, %arg3: memref<1x128xf32, #tpu.memory_space<vmem>>, %arg4: memref<128x128xbf16, #tpu.memory_space<vmem>>, %arg5: memref<1x128xf32, #tpu.memory_space<vmem>>, %arg6: memref<128x128xbf16, #tpu.memory_space<vmem>>, %arg7: memref<1x128xf32, #tpu.memory_space<vmem>>, %arg8: memref<16x8xf32, #tpu.memory_space<vmem>>) attributes {dimension_semantics = [#tpu.dimension_semantics<parallel>], iteration_bounds = array<i64: 1>, scalar_prefetch = 0 : i64, scratch_operands = 0 : i64, tpu.core_type = #tpu.core_type<tc>, window_params = [{transform_indices = @transform_0, window_bounds = array<i64: 16, 32>}, {pipeline_mode = #tpu.pipeline_mode<synchronous>, transform_indices = @transform_1, window_bounds = array<i64: 32, 128>}, {pipeline_mode = #tpu.pipeline_mode<synchronous>, transform_indices = @transform_2, window_bounds = array<i64: 1, 128>}, {pipeline_mode = #tpu.pipeline_mode<synchronous>, transform_indices = @transform_3, window_bounds = array<i64: 128, 128>}, {pipeline_mode = #tpu.pipeline_mode<synchronous>, transform_indices = @transform_4, window_bounds = array<i64: 1, 128>}, {pipeline_mode = #tpu.pipeline_mode<synchronous>, transform_indices = @transform_5, window_bounds = array<i64: 128, 128>}, {pipeline_mode = #tpu.pipeline_mode<synchronous>, transform_indices = @transform_6, window_bounds = array<i64: 1, 128>}, {transform_indices = @transform_7, window_bounds = array<i64: 16, 8>}]} {
    %c0 = arith.constant 0 : index
    %c0_0 = arith.constant 0 : index
    %0 = vector.load %arg1[%c0, %c0_0] : memref<16x32xbf16, #tpu.memory_space<vmem>>, vector<16x32xbf16>
    %c0_1 = arith.constant 0 : index
    %c0_2 = arith.constant 0 : index
    %1 = vector.load %arg2[%c0_1, %c0_2] : memref<32x128xbf16, #tpu.memory_space<vmem>>, vector<32x128xbf16>
    %cst = arith.constant dense<0.000000e+00> : vector<16x128xf32>
    %2 = tpu.matmul %0, %1, %cst {dimension_numbers = #tpu.dot_dimension_numbers<[1], [0], [0], [1], [0, 0, 1, 1], [], []>} : vector<16x32xbf16>, vector<32x128xbf16>, vector<16x128xf32> -> vector<16x128xf32>
    %c0_3 = arith.constant 0 : index
    %c0_4 = arith.constant 0 : index
    %3 = vector.load %arg3[%c0_3, %c0_4] : memref<1x128xf32, #tpu.memory_space<vmem>>, vector<1x128xf32>
    %4 = vector.broadcast %3 : vector<1x128xf32> to vector<16x128xf32>
    %5 = arith.addf %2, %4 : vector<16x128xf32>
    %cst_5 = arith.constant 0.000000e+00 : f32
    %6 = vector.broadcast %cst_5 : f32 to vector<16x128xf32>
    %7 = arith.maximumf %5, %6 : vector<16x128xf32>
    %8 = arith.truncf %7 : vector<16x128xf32> to vector<16x128xbf16>
    %c0_6 = arith.constant 0 : index
    %c0_7 = arith.constant 0 : index
    %9 = vector.load %arg4[%c0_6, %c0_7] : memref<128x128xbf16, #tpu.memory_space<vmem>>, vector<128x128xbf16>
    %cst_8 = arith.constant dense<0.000000e+00> : vector<16x128xf32>
    %10 = tpu.matmul %8, %9, %cst_8 {dimension_numbers = #tpu.dot_dimension_numbers<[1], [0], [0], [1], [0, 0, 1, 1], [], []>} : vector<16x128xbf16>, vector<128x128xbf16>, vector<16x128xf32> -> vector<16x128xf32>
    %c0_9 = arith.constant 0 : index
    %c0_10 = arith.constant 0 : index
    %11 = vector.load %arg5[%c0_9, %c0_10] : memref<1x128xf32, #tpu.memory_space<vmem>>, vector<1x128xf32>
    %12 = vector.broadcast %11 : vector<1x128xf32> to vector<16x128xf32>
    %13 = arith.addf %10, %12 : vector<16x128xf32>
    %cst_11 = arith.constant 0.000000e+00 : f32
    %14 = vector.broadcast %cst_11 : f32 to vector<16x128xf32>
    %15 = arith.maximumf %13, %14 : vector<16x128xf32>
    %16 = arith.truncf %15 : vector<16x128xf32> to vector<16x128xbf16>
    %c0_12 = arith.constant 0 : index
    %c0_13 = arith.constant 0 : index
    %17 = vector.load %arg6[%c0_12, %c0_13] : memref<128x128xbf16, #tpu.memory_space<vmem>>, vector<128x128xbf16>
    %cst_14 = arith.constant dense<0.000000e+00> : vector<16x128xf32>
    %18 = tpu.matmul %16, %17, %cst_14 {dimension_numbers = #tpu.dot_dimension_numbers<[1], [0], [0], [1], [0, 0, 1, 1], [], []>} : vector<16x128xbf16>, vector<128x128xbf16>, vector<16x128xf32> -> vector<16x128xf32>
    %c0_15 = arith.constant 0 : index
    %c0_16 = arith.constant 0 : index
    %19 = vector.load %arg7[%c0_15, %c0_16] : memref<1x128xf32, #tpu.memory_space<vmem>>, vector<1x128xf32>
    %20 = vector.broadcast %19 : vector<1x128xf32> to vector<16x128xf32>
    %21 = arith.addf %18, %20 : vector<16x128xf32>
    %22 = vector.extract_strided_slice %21 {offsets = [0, 0], sizes = [16, 8], strides = [1, 1]} : vector<16x128xf32> to vector<16x8xf32>
    %c0_17 = arith.constant 0 : index
    %c0_18 = arith.constant 0 : index
    %23 = vector.load %arg8[%c0_17, %c0_18] : memref<16x8xf32, #tpu.memory_space<vmem>>, vector<16x8xf32>
    tpu.vector_store %arg8[%c0_17, %c0_18], %22 {strides = array<i32>} : memref<16x8xf32, #tpu.memory_space<vmem>>, vector<16x8xf32>,
    return
  }
  func.func @transform_0(%arg0: i32) -> (i32, i32) {
    %c0_i32 = arith.constant 0 : i32
    %c0_i32_0 = arith.constant 0 : i32
    return %arg0, %c0_i32 : i32, i32
  }
  func.func @transform_1(%arg0: i32) -> (i32, i32) {
    %c0_i32 = arith.constant 0 : i32
    %c0_i32_0 = arith.constant 0 : i32
    %c0_i32_1 = arith.constant 0 : i32
    return %c0_i32, %c0_i32_0 : i32, i32
  }
  func.func @transform_2(%arg0: i32) -> (i32, i32) {
    %c0_i32 = arith.constant 0 : i32
    %c0_i32_0 = arith.constant 0 : i32
    %c0_i32_1 = arith.constant 0 : i32
    return %c0_i32, %c0_i32_0 : i32, i32
  }
  func.func @transform_3(%arg0: i32) -> (i32, i32) {
    %c0_i32 = arith.constant 0 : i32
    %c0_i32_0 = arith.constant 0 : i32
    %c0_i32_1 = arith.constant 0 : i32
    return %c0_i32, %c0_i32_0 : i32, i32
  }
  func.func @transform_4(%arg0: i32) -> (i32, i32) {
    %c0_i32 = arith.constant 0 : i32
    %c0_i32_0 = arith.constant 0 : i32
    %c0_i32_1 = arith.constant 0 : i32
    return %c0_i32, %c0_i32_0 : i32, i32
  }
  func.func @transform_5(%arg0: i32) -> (i32, i32) {
    %c0_i32 = arith.constant 0 : i32
    %c0_i32_0 = arith.constant 0 : i32
    %c0_i32_1 = arith.constant 0 : i32
    return %c0_i32, %c0_i32_0 : i32, i32
  }
  func.func @transform_6(%arg0: i32) -> (i32, i32) {
    %c0_i32 = arith.constant 0 : i32
    %c0_i32_0 = arith.constant 0 : i32
    %c0_i32_1 = arith.constant 0 : i32
    return %c0_i32, %c0_i32_0 : i32, i32
  }
  func.func @transform_7(%arg0: i32) -> (i32, i32) {
    %c0_i32 = arith.constant 0 : i32
    %c0_i32_0 = arith.constant 0 : i32
    return %arg0, %c0_i32 : i32, i32
  }
}

</mosaic_0001>

<bundles_post_ra>
// kernel: actor_forward.1
= control target key start
LH: loop header
LB: loop body
LE: loop exit
PB: predicated region body
PF: predicated region fallthrough
CT: control target
= control target key end

     0   :  { %v452_v0 = vmov 0.0   ;;  %vm453_vm0 = vmmov 0   ;;  %vm57_vm1 = vcmask 261120   ;;  %vm332_vm2 = vcmask 64512   ;;  %s590_s1 = inlined_call_operand.vmem [shape: bf16[32,128], index: 1, kind: input, shape index: {}]   ;;  %s591_s3 = inlined_call_operand.vmem [shape: bf16[128,128], index: 3, kind: input, shape index: {}]   ;;  %s592_s0 = inlined_call_operand.vmem [shape: bf16[16,32], index: 0, kind: input, shape index: {}]   ;;  %s593_s5 = inlined_call_operand.vmem [shape: bf16[128,128], index: 5, kind: input, shape index: {}]   ;;  %s594_s2 = inlined_call_operand.vmem [shape: f32[1,128], index: 2, kind: input, shape index: {}]   ;;  %s595_s4 = inlined_call_operand.vmem [shape: f32[1,128], index: 4, kind: input, shape index: {}]   ;;  %s596_s6 = inlined_call_operand.vmem [shape: f32[1,128], index: 6, kind: input, shape index: {}]   ;;  %s597_s7 = inlined_call_operand.vmem [shape: f32[16,8], index: 7, kind: output, shape index: {}]  }
   0x1   :  { %383 = vmatprep.subr.bf16.mxu0 %v452_v0  ;;  %v433_v1 = vld [vmem:[%s590_s1 + $0x8] sm:$0xff]   ;;  %387 = vmatprep.mubr.msk.bf16.mxu0 %vm453_vm0, %v452_v0  ;;  %v434_v2 = vld [vmem:[%s590_s1] sm:$0xff]   ;;  %v436_v3 = vld [vmem:[%s591_s3 + $0x38] sm:$0xff]  }
   0x2   :  { %391 = vmatprep.subr.bf16.mxu1 %v452_v0  ;;  %407 = vmatprep.mubr.msk.bf16.mxu1 %vm453_vm0, %v452_v0  ;;  %v435_v4 = vld [vmem:[%s592_s0] sm:$0xff]   ;;  %v437_v5 = vld [vmem:[%s591_s3 + $0x30] sm:$0xff]   ;;  %v438_v6 = vld [vmem:[%s591_s3 + $0x28] sm:$0xff]  }
   0x3   :  { %384 = vmatpush3.bf16.msra.mxu0 %v433_v1  ;;  %392 = vmatpush3.bf16.msra.mxu1 %v436_v3  ;;  %v439_v7 = vld [vmem:[%s591_s3 + $0x20] sm:$0xff]   ;;  %v440_v8 = vld [vmem:[%s591_s3 + $0x18] sm:$0xff]   ;;  %v441_v9 = vld [vmem:[%s591_s3 + $0x10] sm:$0xff]  }
   0x4   :  { %385 = vmatprep.subr.bf16.mxu0 %v452_v0  ;;  %393 = vmatprep.subr.bf16.mxu1 %v452_v0  ;;  %v442_v10 = vld [vmem:[%s591_s3 + $0x8] sm:$0xff]   ;;  %v443_v11 = vld [vmem:[%s591_s3] sm:$0xff]   ;;  %v444_v12 = vld [vmem:[%s593_s5 + $0x38] sm:$0xff]  }
   0x5   :  { %v445_v13 = vld [vmem:[%s593_s5 + $0x30] sm:$0xff]   ;;  %v446_v14 = vld [vmem:[%s593_s5 + $0x28] sm:$0xff]   ;;  %v447_v15 = vld [vmem:[%s593_s5 + $0x20] sm:$0xff]  }
   0x6   :  { %v448_v16 = vld [vmem:[%s593_s5 + $0x18] sm:$0xff]   ;;  %v339_v17 = vld [vmem:[%s594_s2] ss:$0 sm:$0xff]  ;;  %v449_v27 = vld [vmem:[%s593_s5 + $0x10] sm:$0xff]  }
   0x7   :  { %386 = vmatpush3.bf16.msra.mxu0 %v434_v2  ;;  %394 = vmatpush3.bf16.msra.mxu1 %v437_v5  ;;  %v450_v28 = vld [vmem:[%s593_s5 + $0x8] sm:$0xff]   ;;  %v451_v29 = vld [vmem:[%s593_s5] sm:$0xff]  }
   0x8   :  { %411 = vmatprep.subr.bf16.mxu0 %v452_v0  ;;  %395 = vmatprep.subr.bf16.mxu1 %v452_v0  ;;  %v344_v30 = vld [vmem:[%s595_s4] ss:$0 sm:$0xff] }
   0x9   :  { %v353_v40 = vld [vmem:[%s596_s6] ss:$0 sm:$0xff] }
   0xa   :  { %388 = vmatmul.mubr.msk.bf16.vlgmr.msra.gmra.mxu0 %vm57_vm1, %v435_v4 }
   0xb   :  { %427 = vmatprep.mubr.msk.bf16.mxu0 %vm453_vm0, %v452_v0  ;;  %396 = vmatpush3.bf16.msra.mxu1 %v438_v6 }
   0xc   :  { %397 = vmatprep.subr.bf16.mxu1 %v452_v0  ;;  %412 = vmatpush3.bf16.msra.mxu0 %v444_v12 }
   0xd   :  { %413 = vmatprep.subr.bf16.mxu0 %v452_v0 }
   0xf   :  { %398 = vmatpush3.bf16.msra.mxu1 %v439_v7 }
  0x10   :  { %399 = vmatprep.subr.bf16.mxu1 %v452_v0  ;;  %414 = vmatpush3.bf16.msra.mxu0 %v445_v13 }
  0x11   :  { %415 = vmatprep.subr.bf16.mxu0 %v452_v0 }
  0x13   :  { %400 = vmatpush3.bf16.msra.mxu1 %v440_v8 }
  0x14   :  { %401 = vmatprep.subr.bf16.mxu1 %v452_v0  ;;  %416 = vmatpush3.bf16.msra.mxu0 %v446_v14 }
  0x15   :  { %417 = vmatprep.subr.bf16.mxu0 %v452_v0 }
  0x17   :  { %402 = vmatpush3.bf16.msra.mxu1 %v441_v9 }
  0x18   :  { %403 = vmatprep.subr.bf16.mxu1 %v452_v0  ;;  %418 = vmatpush3.bf16.msra.mxu0 %v447_v15 }
  0x19   :  { %419 = vmatprep.subr.bf16.mxu0 %v452_v0 }
  0x1b   :  { %404 = vmatpush3.bf16.msra.mxu1 %v442_v10 }
  0x1c   :  { %405 = vmatprep.subr.bf16.mxu1 %v452_v0  ;;  %420 = vmatpush3.bf16.msra.mxu0 %v448_v16 }
  0x1d   :  { %421 = vmatprep.subr.bf16.mxu0 %v452_v0 }
  0x1f   :  { %406 = vmatpush3.bf16.msra.mxu1 %v443_v11 }
  0x20   :  { %422 = vmatpush3.bf16.msra.mxu0 %v449_v27 }
  0x21   :  { %423 = vmatprep.subr.bf16.mxu0 %v452_v0 }
  0x24   :  { %424 = vmatpush3.bf16.msra.mxu0 %v450_v28 }
  0x25   :  { %425 = vmatprep.subr.bf16.mxu0 %v452_v0 }
  0x28   :  { %426 = vmatpush3.bf16.msra.mxu0 %v451_v29 }
  0xca   :  { %v95_v18 = vpop.f32.mrf.mxu0 }
  0xcb   :  { %v96_v20 = vadd.f32 %v339_v17, %v95_v18 }
  0xcc   :  { %v389_v19 = vpop.f32.mrf.mxu0 }
  0xcd   :  { %v102_v24 = vmax.f32 %v96_v20, 0.0 }
  0xce   :  { %v98_v21 = vpop.f32.mrf.mxu0 }
  0xcf   :  { %v99_v22 = vadd.f32 %v339_v17, %v98_v21 }
  0xd0   :  { %v390_v23 = vpop.f32.mrf.mxu0 }
  0xd1   :  { %v103_v25 = vmax.f32 %v99_v22, 0.0 }
  0xd3   :  { %v104_v26 = vpack.c.bf16 %v103_v25, %v102_v24 }
  0xd5   :  { %408 = vmatmul.mubr.bf16.vlgmr.msra.gmra.mxu1 %v104_v26 }
 0x195   :  { %v210_v31 = vpop.f32.mrf.mxu1 }
 0x196   :  { %v211_v33 = vadd.f32 %v344_v30, %v210_v31 }
 0x197   :  { %v409_v32 = vpop.f32.mrf.mxu1 }
 0x198   :  { %v217_v37 = vmax.f32 %v211_v33, 0.0 }
 0x199   :  { %v213_v34 = vpop.f32.mrf.mxu1 }
 0x19a   :  { %v214_v35 = vadd.f32 %v344_v30, %v213_v34 }
 0x19b   :  { %v410_v36 = vpop.f32.mrf.mxu1 }
 0x19c   :  { %v218_v38 = vmax.f32 %v214_v35, 0.0 }
 0x19e   :  { %v219_v39 = vpack.c.bf16 %v218_v38, %v217_v37 }
 0x1a0   :  { %428 = vmatmul.mubr.bf16.vlgmr.msra.gmra.mxu0 %v219_v39 }
 0x260   :  { %v325_v41 = vpop.f32.mrf.mxu0 }
 0x261   :  { %v326_v42 = vadd.f32 %v353_v40, %v325_v41 }
 0x262   :  { %v429_v43 = vpop.f32.mrf.mxu0 }
 0x263   :  { %333 = vst.msk [vmem:[%s597_s7] sm:$0xff] %vm332_vm2, %v326_v42 }
 0x264   :  { %v328_v44 = vpop.f32.mrf.mxu0 }
 0x265   :  { %v329_v45 = vadd.f32 %v353_v40, %v328_v44 }
 0x266   :  { %v430_v46 = vpop.f32.mrf.mxu0 }
 0x267   :  { %334 = vst.msk [vmem:[%s597_s7 + $0x8] sm:$0xff] %vm332_vm2, %v329_v45 }

</bundles_post_ra>
